<compile_context>
chip_gen: v7x
topology: tpu7x:2x2x1
jax: 0.10.0
libtpu: 0.0.40
codegen_flags: <defaults>
</compile_context>

<pallas_src>
import functools

import jax
import jax.numpy as jnp
from jax.experimental import pallas as pl
from jax.experimental.pallas import tpu as pltpu

NEG_SLOPE = 0.2          # LeakyReLU(0.2)
BN_EPS = 1e-5
LANE = 128
ROW_ALIGN = 16           # sublane-safe row alignment for both bf16 and f32 blocks


def _leaky(v):
    return jnp.where(v >= 0, v, NEG_SLOPE * v)


def _round_up(n, m):
    return ((n + m - 1) // m) * m


def _cdiv(a, b):
    return -(-a // b)


# ---------------------------------------------------------------------------
# Kernel: one fused per-token MLP (all BNs + fc_2 pre-folded, Dropout = eval)
# ---------------------------------------------------------------------------
def _mpm_kernel(x_ref,
                w_fc1, b_fc1,
                w_w1, b_w1,
                w_w2, b_w2,
                w_head, b_head,
                out_ref):
    x = x_ref[...]                    # [TN, 2J], compute dtype (bf16)
    cdt = x.dtype

    # encoder2d (Simplemlp): 1x1 conv (+folded BN) -> LeakyReLU -> Dropout(eval)
    h = jnp.dot(x, w_fc1[...], preferred_element_type=jnp.float32) + b_fc1[...]
    h = _leaky(h)                                                   # f32 [TN, 2C]

    # shared_layers_spatial (FCBlock, block_num=1): residual Linear block
    y = jnp.dot(h.astype(cdt), w_w1[...],
                preferred_element_type=jnp.float32) + b_w1[...]
    y = _leaky(y)
    y = jnp.dot(y.astype(cdt), w_w2[...],
                preferred_element_type=jnp.float32) + b_w2[...]
    y = _leaky(y)
    h = h + y

    # TODO(synk): Transformer / Transformer_reduce definitions are not provided
    # in the module source; they are treated as identity over the sequence.

    # FCBlock.fc_2 folded into the fused [fcn_1 | fcn] head at trace time:
    #   (h @ w_fc2 + b_fc2) @ w_heads + b_heads == h @ w_head + b_head
    out_ref[...] = (jnp.dot(h.astype(cdt), w_head[...],
                            preferred_element_type=jnp.float32)
                    + b_head[...]).astype(out_ref.dtype)


PARAM_ORDER = ("w_fc1", "b_fc1", "w_w1", "b_w1", "w_w2", "b_w2",
               "w_head", "b_head")


# ---------------------------------------------------------------------------
# Parameter construction and folding (done once, at trace time)
# ---------------------------------------------------------------------------
def make_raw_params(key, n_joints, channel):
    """Synthetic weights + eval-mode BN stats with the shapes of Model.__init__."""
    c_in = 2 * n_joints          # channel_in of encoder2d
    c2 = 2 * channel             # linear_size
    c = channel
    c_out = 3 * n_joints         # fcn / fcn_1 output channels

    keys = iter(jax.random.split(key, 16))

    def w(ci, co):               # Conv1d(ci, co, k=1) weight, pre-transposed [ci, co]
        return jax.random.normal(next(keys), (ci, co), jnp.float32) * 0.1

    def b(co):
        return jax.random.normal(next(keys), (co,), jnp.float32) * 0.01

    def bn(cc):                  # (gamma, beta, running_mean, running_var) defaults
        return (jnp.ones((cc,), jnp.float32), jnp.zeros((cc,), jnp.float32),
                jnp.zeros((cc,), jnp.float32), jnp.ones((cc,), jnp.float32))

    return dict(
        fc1_w=w(c_in, c2), fc1_b=b(c2), bn1=bn(c2),
        w1_w=w(c2, c2), w1_b=b(c2), lbn1=bn(c2),
        w2_w=w(c2, c2), w2_b=b(c2), lbn2=bn(c2),
        fc2_w=w(c2, c), fc2_b=b(c),
        fcn1_bn=bn(c), fcn1_w=w(c, c_out), fcn1_b=b(c_out),
        fcn_bn=bn(c), fcn_w=w(c, c_out), fcn_b=b(c_out),
    )


def _bn_scale_shift(bn):
    gamma, beta, mean, var = bn
    s = gamma / jnp.sqrt(var + BN_EPS)
    return s, beta - mean * s


def fold_params(raw, n_joints, compute_dtype=jnp.bfloat16):
    """Fold every eval-mode BatchNorm into its adjacent 1x1 conv, fold fc_2 into
    the two output heads, fuse the heads column-wise and zero-pad to a
    lane-dense width."""
    def post_fold(w, b, bn):     # BN(x @ w + b)  ->  x @ (w*s) + (b*s + t)
        s, t = _bn_scale_shift(bn)
        return w * s[None, :], b * s + t

    def pre_fold(w, b, bn):      # BN(x) @ w + b  ->  x @ (diag(s) w) + (t @ w + b)
        s, t = _bn_scale_shift(bn)
        return w * s[:, None], b + t @ w

    w_fc1, b_fc1 = post_fold(raw["fc1_w"], raw["fc1_b"], raw["bn1"])
    # The wrapper feeds tokens in coord-major channel order (coord*J + j) via
    # the cheap (0,2,1,3) permute; torch's conv channels are joint-major
    # (j*2 + coord), so permute the w_fc1 rows accordingly at trace time.
    J = n_joints
    perm = jnp.asarray([(p % J) * 2 + (p // J) for p in range(2 * J)], jnp.int32)
    w_fc1 = w_fc1[perm, :]

    w_w1, b_w1 = post_fold(raw["w1_w"], raw["w1_b"], raw["lbn1"])
    w_w2, b_w2 = post_fold(raw["w2_w"], raw["w2_b"], raw["lbn2"])

    # Output heads: fold each head's leading BN into its conv, concatenate.
    w_h1, b_h1 = pre_fold(raw["fcn1_w"], raw["fcn1_b"], raw["fcn1_bn"])   # x_VTE head
    w_h2, b_h2 = pre_fold(raw["fcn_w"], raw["fcn_b"], raw["fcn_bn"])      # x head
    c_out = w_h1.shape[1]
    w_heads = jnp.concatenate([w_h1, w_h2], axis=1)          # [C, 2*c_out]
    b_heads = jnp.concatenate([b_h1, b_h2], axis=0)

    # Fold fc_2 (2C -> C, nothing nonlinear before the heads) into the head.
    w_comb = raw["fc2_w"] @ w_heads                           # [2C, 2*c_out]
    b_comb = raw["fc2_b"] @ w_heads + b_heads

    width_pad = _round_up(w_comb.shape[1], LANE)
    w_comb = jnp.pad(w_comb, ((0, 0), (0, width_pad - w_comb.shape[1])))
    b_comb = jnp.pad(b_comb, (0, width_pad - b_comb.shape[0]))

    cd = compute_dtype
    params = {
        "w_fc1": w_fc1.astype(cd), "b_fc1": b_fc1[None, :],
        "w_w1": w_w1.astype(cd),   "b_w1": b_w1[None, :],
        "w_w2": w_w2.astype(cd),   "b_w2": b_w2[None, :],
        "w_head": w_comb.astype(cd), "b_head": b_comb[None, :],
    }
    return params, {"c_out": c_out}


# ---------------------------------------------------------------------------
# Tile planning: bounded padding waste, optional 2-way split for v7x megacore
# ---------------------------------------------------------------------------
def _tile_plan(n_rows, tile_cap, split_threshold=512):
    num_tiles = max(1, _cdiv(n_rows, tile_cap))
    # Engage the second TensorCore (v7x) once there is enough real work; for
    # tiny N the kernel is launch-latency bound, so keep a single tile.
    if num_tiles == 1 and n_rows >= split_threshold:
        num_tiles = 2
    tile = _round_up(_cdiv(n_rows, num_tiles), ROW_ALIGN)
    n_pad = tile * num_tiles
    return tile, n_pad


# ---------------------------------------------------------------------------
# Forward wrapper
# ---------------------------------------------------------------------------
@functools.partial(jax.jit, static_argnames=("c_out", "tile_n"))
def mpm_forward(x, params, *, c_out, tile_n=1024):
    """x: [B, 2, F, J, 1] float32. Returns (x_out, x_VTE), each [B, 3, F, J, 1]."""
    B, _, F, J, _ = x.shape
    N = B * F
    c_in = 2 * J
    head_width = params["w_head"].shape[1]
    cdt = params["w_fc1"].dtype

    # torch: x[:,:,:,:,0].permute(0,2,3,1).view(B,F,-1).permute(0,2,1)
    # Use the cheaper (0,2,1,3) permute (minor dim untouched); w_fc1 rows were
    # permuted at trace time to the matching coord-major channel order.
    tokens = jnp.transpose(x[..., 0], (0, 2, 1, 3)).reshape(N, c_in).astype(cdt)

    tile, n_pad = _tile_plan(N, tile_n)
    if n_pad != N:
        tokens = jnp.pad(tokens, ((0, n_pad - N), (0, 0)))

    plist = [params[k] for k in PARAM_ORDER]
    full_spec = lambda a: pl.BlockSpec(a.shape, lambda i: (0, 0))

    out = pl.pallas_call(
        _mpm_kernel,
        grid=(n_pad // tile,),
        in_specs=[pl.BlockSpec((tile, c_in), lambda i: (i, 0))]
                 + [full_spec(p) for p in plist],
        out_specs=pl.BlockSpec((tile, head_width), lambda i: (i, 0)),
        out_shape=jax.ShapeDtypeStruct((n_pad, head_width), cdt),
        compiler_params=pltpu.CompilerParams(
            dimension_semantics=("parallel",)),
    )(tokens, *plist)

    vte_flat = out[:N, :c_out].astype(jnp.float32)            # fcn_1 head
    out_flat = out[:N, c_out:2 * c_out].astype(jnp.float32)   # fcn head

    def to_5d(t):
        # torch: [B, 3J, F] -> view(B, J, 3, F) -> permute(0,2,3,1) -> unsqueeze(-1)
        t = t.reshape(B, F, J, 3)            # joint-major, coord-minor channel split
        t = jnp.transpose(t, (0, 3, 1, 2))   # [B, 3, F, J]
        return t[..., None]                  # [B, 3, F, J, 1]

    return to_5d(out_flat), to_5d(vte_flat)


if __name__ == "__main__":
    B, F, J, CHANNEL = 2, 16, 8, 32          # frames=16, n_joints=8, channel=32

    key = jax.random.PRNGKey(0)
    kx, kp = jax.random.split(key)
    x = jax.random.normal(kx, (B, 2, F, J, 1), jnp.float32)

    raw = make_raw_params(kp, n_joints=J, channel=CHANNEL)
    params, meta = fold_params(raw, n_joints=J)

    out, vte = mpm_forward(x, params, c_out=meta["c_out"])
    jax.block_until_ready((out, vte))

    assert out.shape == (B, 3, F, J, 1) and vte.shape == (B, 3, F, J, 1)
    assert bool(jnp.all(jnp.isfinite(out))) and bool(jnp.all(jnp.isfinite(vte)))
    print("KERNEL_OK")
</pallas_src>

<mosaic_0001>
module attributes {stable_mosaic.version = 11 : i64} {
  func.func @_mpm_kernel(%arg0: i32, %arg1: memref<32x16xbf16, #tpu.memory_space<vmem>>, %arg2: memref<16x64xbf16, #tpu.memory_space<vmem>>, %arg3: memref<1x64xf32, #tpu.memory_space<vmem>>, %arg4: memref<64x64xbf16, #tpu.memory_space<vmem>>, %arg5: memref<1x64xf32, #tpu.memory_space<vmem>>, %arg6: memref<64x64xbf16, #tpu.memory_space<vmem>>, %arg7: memref<1x64xf32, #tpu.memory_space<vmem>>, %arg8: memref<64x128xbf16, #tpu.memory_space<vmem>>, %arg9: memref<1x128xf32, #tpu.memory_space<vmem>>, %arg10: memref<32x128xbf16, #tpu.memory_space<vmem>>) attributes {dimension_semantics = [#tpu.dimension_semantics<parallel>], iteration_bounds = array<i64: 1>, scalar_prefetch = 0 : i64, scratch_operands = 0 : i64, tpu.core_type = #tpu.core_type<tc>, window_params = [{transform_indices = @transform_0, window_bounds = array<i64: 32, 16>}, {pipeline_mode = #tpu.pipeline_mode<synchronous>, transform_indices = @transform_1, window_bounds = array<i64: 16, 64>}, {pipeline_mode = #tpu.pipeline_mode<synchronous>, transform_indices = @transform_2, window_bounds = array<i64: 1, 64>}, {pipeline_mode = #tpu.pipeline_mode<synchronous>, transform_indices = @transform_3, window_bounds = array<i64: 64, 64>}, {pipeline_mode = #tpu.pipeline_mode<synchronous>, transform_indices = @transform_4, window_bounds = array<i64: 1, 64>}, {pipeline_mode = #tpu.pipeline_mode<synchronous>, transform_indices = @transform_5, window_bounds = array<i64: 64, 64>}, {pipeline_mode = #tpu.pipeline_mode<synchronous>, transform_indices = @transform_6, window_bounds = array<i64: 1, 64>}, {pipeline_mode = #tpu.pipeline_mode<synchronous>, transform_indices = @transform_7, window_bounds = array<i64: 64, 128>}, {pipeline_mode = #tpu.pipeline_mode<synchronous>, transform_indices = @transform_8, window_bounds = array<i64: 1, 128>}, {transform_indices = @transform_9, window_bounds = array<i64: 32, 128>}]} {
    %c0 = arith.constant 0 : index
    %c0_0 = arith.constant 0 : index
    %0 = vector.load %arg1[%c0, %c0_0] : memref<32x16xbf16, #tpu.memory_space<vmem>>, vector<32x16xbf16>
    %c0_1 = arith.constant 0 : index
    %c0_2 = arith.constant 0 : index
    %1 = vector.load %arg2[%c0_1, %c0_2] : memref<16x64xbf16, #tpu.memory_space<vmem>>, vector<16x64xbf16>
    %cst = arith.constant dense<0.000000e+00> : vector<32x64xf32>
    %2 = tpu.matmul %0, %1, %cst {dimension_numbers = #tpu.dot_dimension_numbers<[1], [0], [0], [1], [0, 0, 1, 1], [], []>} : vector<32x16xbf16>, vector<16x64xbf16>, vector<32x64xf32> -> vector<32x64xf32>
    %c0_3 = arith.constant 0 : index
    %c0_4 = arith.constant 0 : index
    %3 = vector.load %arg3[%c0_3, %c0_4] : memref<1x64xf32, #tpu.memory_space<vmem>>, vector<1x64xf32>
    %4 = vector.broadcast %3 : vector<1x64xf32> to vector<32x64xf32>
    %5 = arith.addf %2, %4 : vector<32x64xf32>
    %cst_5 = arith.constant 0.000000e+00 : f32
    %6 = vector.broadcast %cst_5 : f32 to vector<32x64xf32>
    %7 = arith.cmpf oge, %5, %6 : vector<32x64xf32>
    %cst_6 = arith.constant 2.000000e-01 : f32
    %8 = vector.broadcast %cst_6 : f32 to vector<32x64xf32>
    %9 = arith.mulf %8, %5 : vector<32x64xf32>
    %10 = arith.select %7, %5, %9 : vector<32x64xi1>, vector<32x64xf32>
    %11 = arith.truncf %10 : vector<32x64xf32> to vector<32x64xbf16>
    %c0_7 = arith.constant 0 : index
    %c0_8 = arith.constant 0 : index
    %12 = vector.load %arg4[%c0_7, %c0_8] : memref<64x64xbf16, #tpu.memory_space<vmem>>, vector<64x64xbf16>
    %cst_9 = arith.constant dense<0.000000e+00> : vector<32x64xf32>
    %13 = tpu.matmul %11, %12, %cst_9 {dimension_numbers = #tpu.dot_dimension_numbers<[1], [0], [0], [1], [0, 0, 1, 1], [], []>} : vector<32x64xbf16>, vector<64x64xbf16>, vector<32x64xf32> -> vector<32x64xf32>
    %c0_10 = arith.constant 0 : index
    %c0_11 = arith.constant 0 : index
    %14 = vector.load %arg5[%c0_10, %c0_11] : memref<1x64xf32, #tpu.memory_space<vmem>>, vector<1x64xf32>
    %15 = vector.broadcast %14 : vector<1x64xf32> to vector<32x64xf32>
    %16 = arith.addf %13, %15 : vector<32x64xf32>
    %cst_12 = arith.constant 0.000000e+00 : f32
    %17 = vector.broadcast %cst_12 : f32 to vector<32x64xf32>
    %18 = arith.cmpf oge, %16, %17 : vector<32x64xf32>
    %cst_13 = arith.constant 2.000000e-01 : f32
    %19 = vector.broadcast %cst_13 : f32 to vector<32x64xf32>
    %20 = arith.mulf %19, %16 : vector<32x64xf32>
    %21 = arith.select %18, %16, %20 : vector<32x64xi1>, vector<32x64xf32>
    %22 = arith.truncf %21 : vector<32x64xf32> to vector<32x64xbf16>
    %c0_14 = arith.constant 0 : index
    %c0_15 = arith.constant 0 : index
    %23 = vector.load %arg6[%c0_14, %c0_15] : memref<64x64xbf16, #tpu.memory_space<vmem>>, vector<64x64xbf16>
    %cst_16 = arith.constant dense<0.000000e+00> : vector<32x64xf32>
    %24 = tpu.matmul %22, %23, %cst_16 {dimension_numbers = #tpu.dot_dimension_numbers<[1], [0], [0], [1], [0, 0, 1, 1], [], []>} : vector<32x64xbf16>, vector<64x64xbf16>, vector<32x64xf32> -> vector<32x64xf32>
    %c0_17 = arith.constant 0 : index
    %c0_18 = arith.constant 0 : index
    %25 = vector.load %arg7[%c0_17, %c0_18] : memref<1x64xf32, #tpu.memory_space<vmem>>, vector<1x64xf32>
    %26 = vector.broadcast %25 : vector<1x64xf32> to vector<32x64xf32>
    %27 = arith.addf %24, %26 : vector<32x64xf32>
    %cst_19 = arith.constant 0.000000e+00 : f32
    %28 = vector.broadcast %cst_19 : f32 to vector<32x64xf32>
    %29 = arith.cmpf oge, %27, %28 : vector<32x64xf32>
    %cst_20 = arith.constant 2.000000e-01 : f32
    %30 = vector.broadcast %cst_20 : f32 to vector<32x64xf32>
    %31 = arith.mulf %30, %27 : vector<32x64xf32>
    %32 = arith.select %29, %27, %31 : vector<32x64xi1>, vector<32x64xf32>
    %33 = arith.addf %10, %32 : vector<32x64xf32>
    %34 = arith.truncf %33 : vector<32x64xf32> to vector<32x64xbf16>
    %c0_21 = arith.constant 0 : index
    %c0_22 = arith.constant 0 : index
    %35 = vector.load %arg8[%c0_21, %c0_22] : memref<64x128xbf16, #tpu.memory_space<vmem>>, vector<64x128xbf16>
    %cst_23 = arith.constant dense<0.000000e+00> : vector<32x128xf32>
    %36 = tpu.matmul %34, %35, %cst_23 {dimension_numbers = #tpu.dot_dimension_numbers<[1], [0], [0], [1], [0, 0, 1, 1], [], []>} : vector<32x64xbf16>, vector<64x128xbf16>, vector<32x128xf32> -> vector<32x128xf32>
    %c0_24 = arith.constant 0 : index
    %c0_25 = arith.constant 0 : index
    %37 = vector.load %arg9[%c0_24, %c0_25] : memref<1x128xf32, #tpu.memory_space<vmem>>, vector<1x128xf32>
    %38 = vector.broadcast %37 : vector<1x128xf32> to vector<32x128xf32>
    %39 = arith.addf %36, %38 : vector<32x128xf32>
    %40 = arith.truncf %39 : vector<32x128xf32> to vector<32x128xbf16>
    %c0_26 = arith.constant 0 : index
    %c0_27 = arith.constant 0 : index
    %41 = vector.load %arg10[%c0_26, %c0_27] : memref<32x128xbf16, #tpu.memory_space<vmem>>, vector<32x128xbf16>
    tpu.vector_store %arg10[%c0_26, %c0_27], %40 {strides = array<i32>} : memref<32x128xbf16, #tpu.memory_space<vmem>>, vector<32x128xbf16>,
    return
  }
  func.func @transform_0(%arg0: i32) -> (i32, i32) {
    %c0_i32 = arith.constant 0 : i32
    %c0_i32_0 = arith.constant 0 : i32
    return %arg0, %c0_i32 : i32, i32
  }
  func.func @transform_1(%arg0: i32) -> (i32, i32) {
    %c0_i32 = arith.constant 0 : i32
    %c0_i32_0 = arith.constant 0 : i32
    %c0_i32_1 = arith.constant 0 : i32
    return %c0_i32, %c0_i32_0 : i32, i32
  }
  func.func @transform_2(%arg0: i32) -> (i32, i32) {
    %c0_i32 = arith.constant 0 : i32
    %c0_i32_0 = arith.constant 0 : i32
    %c0_i32_1 = arith.constant 0 : i32
    return %c0_i32, %c0_i32_0 : i32, i32
  }
  func.func @transform_3(%arg0: i32) -> (i32, i32) {
    %c0_i32 = arith.constant 0 : i32
    %c0_i32_0 = arith.constant 0 : i32
    %c0_i32_1 = arith.constant 0 : i32
    return %c0_i32, %c0_i32_0 : i32, i32
  }
  func.func @transform_4(%arg0: i32) -> (i32, i32) {
    %c0_i32 = arith.constant 0 : i32
    %c0_i32_0 = arith.constant 0 : i32
    %c0_i32_1 = arith.constant 0 : i32
    return %c0_i32, %c0_i32_0 : i32, i32
  }
  func.func @transform_5(%arg0: i32) -> (i32, i32) {
    %c0_i32 = arith.constant 0 : i32
    %c0_i32_0 = arith.constant 0 : i32
    %c0_i32_1 = arith.constant 0 : i32
    return %c0_i32, %c0_i32_0 : i32, i32
  }
  func.func @transform_6(%arg0: i32) -> (i32, i32) {
    %c0_i32 = arith.constant 0 : i32
    %c0_i32_0 = arith.constant 0 : i32
    %c0_i32_1 = arith.constant 0 : i32
    return %c0_i32, %c0_i32_0 : i32, i32
  }
  func.func @transform_7(%arg0: i32) -> (i32, i32) {
    %c0_i32 = arith.constant 0 : i32
    %c0_i32_0 = arith.constant 0 : i32
    %c0_i32_1 = arith.constant 0 : i32
    return %c0_i32, %c0_i32_0 : i32, i32
  }
  func.func @transform_8(%arg0: i32) -> (i32, i32) {
    %c0_i32 = arith.constant 0 : i32
    %c0_i32_0 = arith.constant 0 : i32
    %c0_i32_1 = arith.constant 0 : i32
    return %c0_i32, %c0_i32_0 : i32, i32
  }
  func.func @transform_9(%arg0: i32) -> (i32, i32) {
    %c0_i32 = arith.constant 0 : i32
    %c0_i32_0 = arith.constant 0 : i32
    return %arg0, %c0_i32 : i32, i32
  }
}

</mosaic_0001>

<bundles_post_ra>
// kernel: mpm_forward.1
= control target key start
LH: loop header
LB: loop body
LE: loop exit
PB: predicated region body
PF: predicated region fallthrough
CT: control target
= control target key end

     0   :  { %vm62_vm0 = vcmask 130048   ;;  %vm171_vm5 = vcmask 523264   ;;  %s730_s1 = inlined_call_operand.vmem [shape: bf16[16,64], index: 1, kind: input, shape index: {}]   ;;  %s731_s0 = inlined_call_operand.vmem [shape: bf16[32,16], index: 0, kind: input, shape index: {}]   ;;  %s732_s3 = inlined_call_operand.vmem [shape: bf16[64,64], index: 3, kind: input, shape index: {}]   ;;  %s733_s5 = inlined_call_operand.vmem [shape: bf16[64,64], index: 5, kind: input, shape index: {}]   ;;  %s734_s2 = inlined_call_operand.vmem [shape: f32[1,64], index: 2, kind: input, shape index: {}]   ;;  %s735_s7 = inlined_call_operand.vmem [shape: bf16[64,128], index: 7, kind: input, shape index: {}]   ;;  %s736_s4 = inlined_call_operand.vmem [shape: f32[1,64], index: 4, kind: input, shape index: {}]   ;;  %s737_s6 = inlined_call_operand.vmem [shape: f32[1,64], index: 6, kind: input, shape index: {}]   ;;  %s738_s8 = inlined_call_operand.vmem [shape: f32[1,128], index: 8, kind: input, shape index: {}]   ;;  %s739_s9 = inlined_call_operand.vmem [shape: bf16[32,128], index: 9, kind: output, shape index: {}]  }
   0x1   :  { %v580_v0 = vld [vmem:[%s730_s1] sm:$0xff]   ;;  %v582_v2 = vld [vmem:[%s731_s0 + $0x8] sm:$0xff]   ;;  %v585_v5 = vld [vmem:[%s732_s3 + $0x10] sm:$0xff]  }
   0x2   :  { %v581_v1 = vld [vmem:[%s731_s0] sm:$0xff]   ;;  %538 = vmatprep.subr.bf16.mxu0 %v580_v0  ;;  %v584_v4 = vld [vmem:[%s732_s3 + $0x8] sm:$0xff]   ;;  %v586_v6 = vld [vmem:[%s732_s3 + $0x18] sm:$0xff]  }
   0x3   :  { %539 = vmatpush3.bf16.msra.mxu0 %v580_v0  ;;  %540 = vmatprep.mubr.msk.bf16.mxu0 %vm62_vm0, %v581_v1  ;;  %v583_v3 = vld [vmem:[%s732_s3] sm:$0xff]   ;;  %v588_v27 = vld [vmem:[%s733_s5 + $0x8] sm:$0xff]   ;;  %v589_v28 = vld [vmem:[%s733_s5 + $0x10] sm:$0xff]  }
   0x4   :  { %544 = vmatprep.subr.bf16.mxu1 %v583_v3  ;;  %v587_v7 = vld [vmem:[%s733_s5] sm:$0xff]   ;;  %v590_v29 = vld [vmem:[%s733_s5 + $0x18] sm:$0xff]   ;;  %v592_v50 = vld [vmem:[%s735_s7 + $0x8] sm:$0xff]  }
   0x5   :  { %545 = vmatpush3.bf16.msra.mxu1 %v583_v3  ;;  %556 = vmatprep.subr.bf16.mxu0 %v587_v7  ;;  %v471_v8 = vld [vmem:[%s734_s2] ss:$0 sm:$0xff]  ;;  %v593_v51 = vld [vmem:[%s735_s7 + $0x10] sm:$0xff]   ;;  %v594_v52 = vld [vmem:[%s735_s7 + $0x18] sm:$0xff]  }
   0x6   :  { %541 = vmatmul.mubr.msk.bf16.vlgmr.msra.gmra.mrb[0].mxu0 %vm62_vm0, %v582_v2  ;;  %546 = vmatprep.subr.bf16.mxu1 %v584_v4  ;;  %v591_v30 = vld [vmem:[%s735_s7] sm:$0xff]  }
   0x7   :  { %557 = vmatpush3.bf16.msra.mxu0 %v587_v7  ;;  %v477_v31 = vld [vmem:[%s736_s4] ss:$0 sm:$0xff] }
   0x8   :  { %558 = vmatprep.subr.bf16.mxu0 %v588_v27  ;;  %v484_v53 = vld [vmem:[%s737_s6] ss:$0 sm:$0xff] }
   0x9   :  { %547 = vmatpush3.bf16.msra.mxu1 %v584_v4 }
   0xa   :  { %548 = vmatprep.subr.bf16.mxu1 %v585_v5 }
   0xb   :  { %559 = vmatpush3.bf16.msra.mxu0 %v588_v27 }
   0xc   :  { %560 = vmatprep.subr.bf16.mxu0 %v589_v28 }
   0xd   :  { %549 = vmatpush3.bf16.msra.mxu1 %v585_v5 }
   0xe   :  { %550 = vmatprep.subr.bf16.mxu1 %v586_v6 }
   0xf   :  { %561 = vmatpush3.bf16.msra.mxu0 %v589_v28 }
  0x10   :  { %562 = vmatprep.subr.bf16.mxu0 %v590_v29 }
  0x11   :  { %551 = vmatpush3.bf16.msra.mxu1 %v586_v6 }
  0x12   :  { %568 = vmatprep.subr.bf16.mxu1 %v591_v30 }
  0x13   :  { %563 = vmatpush3.bf16.msra.mxu0 %v590_v29 }
  0xd9   :  { %v542_v9 = vpop.f32.mrb[0].mxu0 }
  0xda   :  { %v112_v10 = vadd.f32 %v542_v9, %v471_v8  ;;  %v103_v11 = vpop.f32.mrb[1].mxu0 }
  0xdb   :  { %v104_v12 = vadd.f32 %v471_v8, %v103_v11  ;;  %v543_v13 = vpop.f32.mrb[2].mxu0 }
  0xdc   :  { %v115_v14 = vadd.f32 %v543_v13, %v471_v8  ;;  %v106_v15 = vpop.f32.mrb[3].mxu0  ;;  %v124_v18 = vmul.f32 0.2, %v112_v10  ;;  %vm120_vm3 = vcmp.ge.f32.partialorder %v112_v10, 0.0  ;;  %v491_v13 = vld [vmem:[%s738_s8] ss:$0 sm:$0xff] }
  0xdd   :  { %v122_v16 = vmul.f32 0.2, %v104_v12  ;;  %v107_v17 = vadd.f32 %v471_v8, %v106_v15  ;;  %vm118_vm2 = vcmp.ge.f32.partialorder %v104_v12, 0.0 }
  0xde   :  { %vm121_vm1 = vcmp.ge.f32.partialorder %v115_v14, 0.0  ;;  %v125_v19 = vmul.f32 0.2, %v115_v14  ;;  %v678_v24 = vsel %vm120_vm3, %v112_v10, %v124_v18 }
  0xdf   :  { %v123_v20 = vmul.f32 0.2, %v107_v17  ;;  %vm119_vm4 = vcmp.ge.f32.partialorder %v107_v17, 0.0  ;;  %v674_v22 = vsel %vm118_vm2, %v104_v12, %v122_v16 }
  0xe0   :  { %v672_v21 = vsel %vm121_vm1, %v115_v14, %v125_v19 }
  0xe1   :  { %v676_v23 = vsel %vm119_vm4, %v107_v17, %v123_v20  ;;  %v131_v26 = vpack.c.bf16 %v672_v21, %v678_v24 }
  0xe2   :  { %v130_v25 = vpack.c.bf16 %v676_v23, %v674_v22 }
  0xe4   :  { %552 = vmatprep.mubr.msk.bf16.mxu1 %vm171_vm5, %v130_v25 }
  0xe5   :  { %553 = vmatmul.mubr.msk.bf16.vlgmr.msra.gmra.mrb[0].mxu1 %vm171_vm5, %v131_v26 }
  0xe6   :  { %569 = vmatpush3.bf16.msra.mxu1 %v591_v30 }
  0xe7   :  { %570 = vmatprep.subr.bf16.mxu1 %v592_v50 }
  0xea   :  { %571 = vmatpush3.bf16.msra.mxu1 %v592_v50 }
  0xeb   :  { %572 = vmatprep.subr.bf16.mxu1 %v593_v51 }
  0xee   :  { %573 = vmatpush3.bf16.msra.mxu1 %v593_v51 }
  0xef   :  { %574 = vmatprep.subr.bf16.mxu1 %v594_v52 }
  0xf2   :  { %575 = vmatpush3.bf16.msra.mxu1 %v594_v52 }
 0x1b8   :  { %v554_v32 = vpop.f32.mrb[0].mxu1 }
 0x1b9   :  { %v221_v33 = vadd.f32 %v554_v32, %v477_v31  ;;  %v212_v34 = vpop.f32.mrb[1].mxu1 }
 0x1ba   :  { %v213_v35 = vadd.f32 %v477_v31, %v212_v34  ;;  %v555_v36 = vpop.f32.mrb[2].mxu1 }
 0x1bb   :  { %v233_v37 = vmul.f32 0.2, %v221_v33  ;;  %v224_v38 = vadd.f32 %v555_v36, %v477_v31  ;;  %v215_v39 = vpop.f32.mrb[3].mxu1  ;;  %vm229_vm6 = vcmp.ge.f32.partialorder %v221_v33, 0.0 }
 0x1bc   :  { %v231_v40 = vmul.f32 0.2, %v213_v35  ;;  %v216_v41 = vadd.f32 %v477_v31, %v215_v39  ;;  %vm227_vm7 = vcmp.ge.f32.partialorder %v213_v35, 0.0 }
 0x1bd   :  { %vm230_vm8 = vcmp.ge.f32.partialorder %v224_v38, 0.0  ;;  %v234_v42 = vmul.f32 0.2, %v224_v38  ;;  %v237_v44 = vsel %vm229_vm6, %v221_v33, %v233_v37 }
 0x1be   :  { %vm228_vm9 = vcmp.ge.f32.partialorder %v216_v41, 0.0  ;;  %v232_v43 = vmul.f32 0.2, %v216_v41  ;;  %v235_v46 = vsel %vm227_vm7, %v213_v35, %v231_v40 }
 0x1bf   :  { %v238_v45 = vsel %vm230_vm8, %v224_v38, %v234_v42 }
 0x1c0   :  { %v240_v47 = vpack.c.bf16 %v238_v45, %v237_v44  ;;  %v236_v48 = vsel %vm228_vm9, %v216_v41, %v232_v43 }
 0x1c1   :  { %v239_v49 = vpack.c.bf16 %v236_v48, %v235_v46 }
 0x1c3   :  { %564 = vmatprep.mubr.msk.bf16.mxu0 %vm171_vm5, %v239_v49 }
 0x1c4   :  { %565 = vmatmul.mubr.msk.bf16.vlgmr.msra.gmra.mrb[4].mxu0 %vm171_vm5, %v240_v47 }
 0x297   :  { %v566_v54 = vpop.f32.mrb[4].mxu0 }
 0x298   :  { %v329_v55 = vadd.f32 %v566_v54, %v484_v53  ;;  %v320_v56 = vpop.f32.mrb[5].mxu0 }
 0x299   :  { %v321_v57 = vadd.f32 %v484_v53, %v320_v56  ;;  %v567_v58 = vpop.f32.mrb[6].mxu0 }
 0x29a   :  { %vm337_vm10 = vcmp.ge.f32.partialorder %v329_v55, 0.0  ;;  %v341_v59 = vmul.f32 0.2, %v329_v55  ;;  %v332_v60 = vadd.f32 %v567_v58, %v484_v53  ;;  %v323_v61 = vpop.f32.mrb[7].mxu0 }
 0x29b   :  { %vm335_vm11 = vcmp.ge.f32.partialorder %v321_v57, 0.0  ;;  %v339_v62 = vmul.f32 0.2, %v321_v57  ;;  %v324_v63 = vadd.f32 %v484_v53, %v323_v61 }
 0x29c   :  { %v345_v0 = vsel %vm337_vm10, %v329_v55, %v341_v59  ;;  %vm338_vm12 = vcmp.ge.f32.partialorder %v332_v60, 0.0  ;;  %v342_v1 = vmul.f32 0.2, %v332_v60 }
 0x29d   :  { %v343_v2 = vsel %vm335_vm11, %v321_v57, %v339_v62  ;;  %vm336_vm13 = vcmp.ge.f32.partialorder %v324_v63, 0.0  ;;  %v340_v3 = vmul.f32 0.2, %v324_v63  ;;  %v349_v5 = vadd.f32 %v345_v0, %v678_v24 }
 0x29e   :  { %v346_v4 = vsel %vm338_vm12, %v332_v60, %v342_v1  ;;  %v347_v8 = vadd.f32 %v343_v2, %v674_v22 }
 0x29f   :  { %v350_v6 = vadd.f32 %v346_v4, %v672_v21  ;;  %v344_v7 = vsel %vm336_vm13, %v324_v63, %v340_v3 }
 0x2a0   :  { %v348_v9 = vadd.f32 %v344_v7, %v676_v23 }
 0x2a1   :  { %v352_v10 = vpack.c.bf16 %v350_v6, %v349_v5 }
 0x2a2   :  { %v351_v11 = vpack.c.bf16 %v348_v9, %v347_v8 }
 0x2a4   :  { %576 = vmatprep.mubr.msk.bf16.mxu1 %vm171_vm5, %v351_v11 }
 0x2a5   :  { %577 = vmatmul.mubr.msk.bf16.vlgmr.msra.gmra.mrb[4].mxu1 %vm171_vm5, %v352_v10 }
 0x378   :  { %v578_v12 = vpop.f32.mrb[4].mxu1 }
 0x379   :  { %v432_v14 = vpop.f32.mrb[5].mxu1  ;;  %v441_v16 = vadd.f32 %v578_v12, %v491_v13 }
 0x37a   :  { %v579_v15 = vpop.f32.mrb[6].mxu1  ;;  %v433_v19 = vadd.f32 %v491_v13, %v432_v14 }
 0x37b   :  { %v444_v17 = vadd.f32 %v579_v15, %v491_v13  ;;  %v435_v18 = vpop.f32.mrb[7].mxu1 }
 0x37c   :  { %v436_v20 = vadd.f32 %v491_v13, %v435_v18 }
 0x37d   :  { %v514_v21 = vpack.c.bf16 %v444_v17, %v441_v16 }
 0x37e   :  { %v509_v22 = vpack.c.bf16 %v436_v20, %v433_v19 }
 0x37f   :  { %516 = vst [vmem:[%s739_s9 + $0x8] sm:$0xff] %v514_v21  }
 0x380   :  { %510 = vst [vmem:[%s739_s9] sm:$0xff] %v509_v22  }

</bundles_post_ra>
